<compile_context>
chip_gen: v5e
topology: v5e:2x2
jax: 0.10.0
libtpu: 0.0.40
codegen_flags: <defaults>
</compile_context>

<pallas_src>
import numpy as np
import jax
import jax.numpy as jnp
from jax.experimental import pallas as pl
from jax.experimental.pallas import tpu as pltpu

NEG_SLOPE = 0.1  # LeakyReLU slope used by CA_layer


# ----------------------------------------------------------------------------
# Fused Pallas kernel: attention MLP + per-channel feature scaling
# ----------------------------------------------------------------------------
def _ca_kernel(kv_ref, w1_ref, w2_ref, feat_ref, o_ref):
    """
    kv_ref   : (1, 1, C_in)      degradation vector of this batch element
    w1_ref   : (C_in, C_in//r)   first 1x1 conv weight (stored transposed, bias-free)
    w2_ref   : (C_in//r, C_out)  second 1x1 conv weight (stored transposed, bias-free)
    feat_ref : (1, C_out, T_HW)  feature tile: channels on sublanes, H*W strip on lanes
    o_ref    : (1, C_out, T_HW)
    """
    kv = kv_ref[0]                                                          # (1, C_in)

    # tiny bias-free MLP: Conv1x1 -> LeakyReLU(0.1) -> Conv1x1 -> Sigmoid
    a1 = jnp.dot(kv, w1_ref[...], preferred_element_type=jnp.float32)
    a1 = jnp.maximum(a1, NEG_SLOPE * a1)                                    # LeakyReLU(0.1)
    att = jax.nn.sigmoid(
        jnp.dot(a1, w2_ref[...], preferred_element_type=jnp.float32))       # (1, C_out)

    # channel attention: scale each channel (sublane) of the feature strip
    o_ref[...] = (feat_ref[...] * att[:, :, None]).astype(o_ref.dtype)


def ca_layer(feat_nchw, kv, w1, w2, *, hw_tile=2048):
    """CA_layer forward.

    feat_nchw : (B, C_out, H, W)  -- x[0] of the PyTorch reference (NCHW)
    kv        : (B, C_in)         -- x[1] of the PyTorch reference
    w1        : (C_in, C_in//reduction)   == conv_du[0].weight[:, :, 0, 0].T
    w2        : (C_in//reduction, C_out)  == conv_du[2].weight[:, :, 0, 0].T
    """
    B, C, H, W = feat_nchw.shape
    HW = H * W
    C_in, hidden = w1.shape
    assert kv.shape == (B, C_in)
    assert w2.shape == (hidden, C)

    feat3 = feat_nchw.reshape(B, C, HW)          # lane axis = H*W (lane-dense)
    kv3 = kv.reshape(B, 1, C_in)                 # block == full extent on last two dims

    # Spatial strip size: a multiple of 128 that divides HW when possible
    # (unmasked full-lane stores); otherwise fall back to one full-extent strip.
    if HW % 128 == 0:
        t_hw = min(HW, hw_tile)
        while HW % t_hw != 0:
            t_hw -= 128
    else:
        # TODO(synk): odd H*W falls back to one full-extent strip; fine for small
        # inputs but not VMEM-tiled for very large non-128-multiple resolutions.
        t_hw = HW
    n_hw = HW // t_hw

    out = pl.pallas_call(
        _ca_kernel,
        out_shape=jax.ShapeDtypeStruct((B, C, HW), feat3.dtype),
        grid=(B, n_hw),
        in_specs=[
            pl.BlockSpec((1, 1, C_in), lambda b, j: (b, 0, 0)),   # kv row of batch b
            pl.BlockSpec((C_in, hidden), lambda b, j: (0, 0)),    # W1 (VMEM-resident)
            pl.BlockSpec((hidden, C), lambda b, j: (0, 0)),       # W2 (VMEM-resident)
            pl.BlockSpec((1, C, t_hw), lambda b, j: (b, 0, j)),   # feature strip
        ],
        out_specs=pl.BlockSpec((1, C, t_hw), lambda b, j: (b, 0, j)),
        compiler_params=pltpu.CompilerParams(
            dimension_semantics=("parallel", "parallel")),
    )(kv3, w1, w2, feat3)

    return out.reshape(B, C, H, W)


# ----------------------------------------------------------------------------
# Pure-JAX reference (mirrors the PyTorch module exactly)
# ----------------------------------------------------------------------------
def ca_layer_ref(feat_nchw, kv, w1, w2):
    a1 = kv @ w1
    a1 = jnp.maximum(a1, NEG_SLOPE * a1)           # LeakyReLU(0.1)
    att = jax.nn.sigmoid(a1 @ w2)                  # (B, C_out)
    return feat_nchw * att[:, :, None, None]


if __name__ == "__main__":
    # DASR defaults: channels_in = channels_out = 64, reduction = 8
    B, C_in, C_out, reduction, H, W = 2, 64, 64, 8, 16, 16
    hidden = C_in // reduction

    key = jax.random.PRNGKey(0)
    kf, kd, k1, k2 = jax.random.split(key, 4)
    feat = jax.random.normal(kf, (B, C_out, H, W), jnp.float32)      # x[0]  (NCHW)
    kv = jax.random.normal(kd, (B, C_in), jnp.float32)               # x[1]
    w1 = jax.random.normal(k1, (C_in, hidden), jnp.float32) / np.sqrt(C_in)
    w2 = jax.random.normal(k2, (hidden, C_out), jnp.float32) / np.sqrt(hidden)

    fwd = jax.jit(ca_layer)
    out = jax.block_until_ready(fwd(feat, kv, w1, w2))

    ref = ca_layer_ref(feat, kv, w1, w2)
    assert out.shape == (B, C_out, H, W), out.shape
    assert bool(jnp.all(jnp.isfinite(out)))
    assert bool(jnp.allclose(out, ref, atol=1e-5, rtol=1e-5))
    print("KERNEL_OK")
</pallas_src>

<mosaic_0001>
module attributes {stable_mosaic.version = 11 : i64} {
  func.func @_ca_kernel(%arg0: i32, %arg1: i32, %arg2: memref<1x1x64xf32, #tpu.memory_space<vmem>>, %arg3: memref<64x8xf32, #tpu.memory_space<vmem>>, %arg4: memref<8x64xf32, #tpu.memory_space<vmem>>, %arg5: memref<1x64x256xf32, #tpu.memory_space<vmem>>, %arg6: memref<1x64x256xf32, #tpu.memory_space<vmem>>) attributes {dimension_semantics = [#tpu.dimension_semantics<parallel>, #tpu.dimension_semantics<parallel>], iteration_bounds = array<i64: 2, 1>, scalar_prefetch = 0 : i64, scratch_operands = 0 : i64, tpu.core_type = #tpu.core_type<tc>, window_params = [{transform_indices = @transform_0, window_bounds = array<i64: 1, 1, 64>}, {pipeline_mode = #tpu.pipeline_mode<synchronous>, transform_indices = @transform_1, window_bounds = array<i64: 64, 8>}, {pipeline_mode = #tpu.pipeline_mode<synchronous>, transform_indices = @transform_2, window_bounds = array<i64: 8, 64>}, {transform_indices = @transform_3, window_bounds = array<i64: 1, 64, 256>}, {transform_indices = @transform_4, window_bounds = array<i64: 1, 64, 256>}]} {
    %c0 = arith.constant 0 : index
    %c0_0 = arith.constant 0 : index
    %c0_1 = arith.constant 0 : index
    %0 = vector.load %arg2[%c0, %c0_0, %c0_1] : memref<1x1x64xf32, #tpu.memory_space<vmem>>, vector<1x1x64xf32>
    %1 = vector.shape_cast %0 : vector<1x1x64xf32> to vector<1x64xf32>
    %c0_2 = arith.constant 0 : index
    %c0_3 = arith.constant 0 : index
    %2 = vector.load %arg3[%c0_2, %c0_3] : memref<64x8xf32, #tpu.memory_space<vmem>>, vector<64x8xf32>
    %cst = arith.constant dense<0.000000e+00> : vector<1x8xf32>
    %3 = tpu.matmul %1, %2, %cst {dimension_numbers = #tpu.dot_dimension_numbers<[1], [0], [0], [1], [0, 0, 1, 1], [], []>} : vector<1x64xf32>, vector<64x8xf32>, vector<1x8xf32> -> vector<1x8xf32>
    %cst_4 = arith.constant 1.000000e-01 : f32
    %4 = vector.broadcast %cst_4 : f32 to vector<1x8xf32>
    %5 = arith.mulf %4, %3 : vector<1x8xf32>
    %6 = arith.maximumf %3, %5 : vector<1x8xf32>
    %c0_5 = arith.constant 0 : index
    %c0_6 = arith.constant 0 : index
    %7 = vector.load %arg4[%c0_5, %c0_6] : memref<8x64xf32, #tpu.memory_space<vmem>>, vector<8x64xf32>
    %cst_7 = arith.constant dense<0.000000e+00> : vector<1x64xf32>
    %8 = tpu.matmul %6, %7, %cst_7 {dimension_numbers = #tpu.dot_dimension_numbers<[1], [0], [0], [1], [0, 0, 1, 1], [], []>} : vector<1x8xf32>, vector<8x64xf32>, vector<1x64xf32> -> vector<1x64xf32>
    %9 = arith.negf %8 : vector<1x64xf32>
    %10 = math.exp %9 : vector<1x64xf32>
    %cst_8 = arith.constant 1.000000e+00 : f32
    %11 = vector.broadcast %cst_8 : f32 to vector<1x64xf32>
    %12 = arith.addf %11, %10 : vector<1x64xf32>
    %13 = arith.divf %11, %12 : vector<1x64xf32>
    %c0_9 = arith.constant 0 : index
    %c0_10 = arith.constant 0 : index
    %c0_11 = arith.constant 0 : index
    %14 = vector.load %arg5[%c0_9, %c0_10, %c0_11] : memref<1x64x256xf32, #tpu.memory_space<vmem>>, vector<1x64x256xf32>
    %15 = vector.shape_cast %13 : vector<1x64xf32> to vector<1x64x1xf32>
    %16 = vector.broadcast %15 : vector<1x64x1xf32> to vector<1x64x256xf32>
    %17 = arith.mulf %14, %16 : vector<1x64x256xf32>
    %c0_12 = arith.constant 0 : index
    %c0_13 = arith.constant 0 : index
    %c0_14 = arith.constant 0 : index
    %18 = vector.load %arg6[%c0_12, %c0_13, %c0_14] : memref<1x64x256xf32, #tpu.memory_space<vmem>>, vector<1x64x256xf32>
    tpu.vector_store %arg6[%c0_12, %c0_13, %c0_14], %17 {strides = array<i32>} : memref<1x64x256xf32, #tpu.memory_space<vmem>>, vector<1x64x256xf32>,
    return
  }
  func.func @transform_0(%arg0: i32, %arg1: i32) -> (i32, i32, i32) {
    %c0_i32 = arith.constant 0 : i32
    %c0_i32_0 = arith.constant 0 : i32
    %c0_i32_1 = arith.constant 0 : i32
    return %arg0, %c0_i32, %c0_i32_0 : i32, i32, i32
  }
  func.func @transform_1(%arg0: i32, %arg1: i32) -> (i32, i32) {
    %c0_i32 = arith.constant 0 : i32
    %c0_i32_0 = arith.constant 0 : i32
    %c0_i32_1 = arith.constant 0 : i32
    return %c0_i32, %c0_i32_0 : i32, i32
  }
  func.func @transform_2(%arg0: i32, %arg1: i32) -> (i32, i32) {
    %c0_i32 = arith.constant 0 : i32
    %c0_i32_0 = arith.constant 0 : i32
    %c0_i32_1 = arith.constant 0 : i32
    return %c0_i32, %c0_i32_0 : i32, i32
  }
  func.func @transform_3(%arg0: i32, %arg1: i32) -> (i32, i32, i32) {
    %c0_i32 = arith.constant 0 : i32
    %c0_i32_0 = arith.constant 0 : i32
    return %arg0, %c0_i32, %arg1 : i32, i32, i32
  }
  func.func @transform_4(%arg0: i32, %arg1: i32) -> (i32, i32, i32) {
    %c0_i32 = arith.constant 0 : i32
    %c0_i32_0 = arith.constant 0 : i32
    return %arg0, %c0_i32, %arg1 : i32, i32, i32
  }
}

</mosaic_0001>

<bundles_post_ra>
// kernel: ca_layer.1
= control target key start
LH: loop header
LB: loop body
LE: loop exit
PB: predicated region body
PF: predicated region fallthrough
CT: control target
= control target key end

     0   :  { %s625_s15 = smov 0   ;;  %s627_s16 = smov 0   ;;  %s728_s0 = inlined_call_operand.vmem [shape: f32[2,1,64], index: 0, kind: input, shape index: {}]   ;;  %s729_s1 = inlined_call_operand.vmem [shape: f32[64,8], index: 1, kind: input, shape index: {}]   ;;  %s730_s2 = inlined_call_operand.vmem [shape: f32[8,64], index: 2, kind: input, shape index: {}]   ;;  %s731_s3 = inlined_call_operand.vmem [shape: f32[2,64,256], index: 3, kind: input, shape index: {}]   ;;  %s732_s4 = inlined_call_operand.vmem [shape: f32[2,64,256], index: 4, kind: output, shape index: {}]  }
   0x1   :  { %s629_s17 = smov 0  }
   0x2 LB: > { %s26_s18 = sadd.s32 1, %s594_s16  ;;  %p527_p0 = scmp.ge.s32.totalorder %s598_s17, 1  ;;  %s598_s17 = sphi %s629_s17, %s14_s17   ;;  %s594_s16 = sphi %s627_s16, %s734_s16   ;;  %s590_s15 = sphi %s625_s15, %s733_s15  }
   0x3   : > { %p28_p1 = scmp.ge.s32.totalorder %s26_s18, 2  ;;  %p191_p2 = scmp.lt.s32.totalorder %s598_s17, 3 }
   0x5   : > { %s736_s18 = smov (%p28_p1, %s26_s18), 0  ;;  %p192_p3 = pnand %p527_p0, %p191_p2 }
   0x6   : > { %p228_p4 = scmp.lt.s32.totalorder (!%p192_p3), %s590_s15, 1 }
   0x7   : > { %195 = sbr.rel (%p192_p3) target bundleno = 465 (0x1d1), region = 36 }
   0xc   : > { %v259_v0 = vld [vmem:[%s729_s1 + $0x38] sm:$0xff]  ;;  %v258_v1 = vld [vmem:[%s729_s1 + $0x30] sm:$0xff]  ;;  %v257_v2 = vld [vmem:[%s729_s1 + $0x28] sm:$0xff]  ;;  %s738_s15 = smov (!%p228_p4, %s590_s15), 1  ;;  %vm260_vm0 = vcmask 523264   ;;  %vm287_vm1 = vcmask 64512   ;;  %v347_v13 = vlaneseq }
   0xd   : > { %272 = vmatpush.msra.mxu0 %v259_v0  ;;  %v256_v3 = vld [vmem:[%s729_s1 + $0x20] sm:$0xff]  ;;  %v255_v4 = vld [vmem:[%s729_s1 + $0x18] sm:$0xff]  ;;  %v254_v5 = vld [vmem:[%s729_s1 + $0x10] sm:$0xff]  ;;  %s230_s9 = scalar_lea.vmem %s728_s0, %s738_s15  ;;  %s537_s14 = sshll.u32 %s738_s15, 7 }
   0xe   : > { %v253_v6 = vld [vmem:[%s729_s1 + $0x8] sm:$0xff]  ;;  %v252_v7 = vld [vmem:[%s729_s1] sm:$0xff]  ;;  %v348_v14 = vshrl.u32 %v347_v13, 7  ;;  %s680_s21 = scalar_lea.vmem %s731_s3, %s537_s14  ;;  %s687_s24 = scalar_lea.vmem %s732_s4, %s537_s14 }
   0xf   : > { %273 = vmatpush.msra.mxu0 %v258_v1  ;;  %v251_v8 = vld [vmem:[%s230_s9] sm:$0x1]  ;;  %v339_v38 = vld [vmem:[%s680_s21 + $0x48] sm:$0xff]  ;;  %v340_v42 = vld [vmem:[%s680_s21 + $0x50] sm:$0xff] }
  0x10   : > { %v286_v9 = vld [vmem:[%s730_s2] sm:$0xff]  ;;  %563 = vset.pattern.permute.xlu0 %v348_v14  ;;  %v373_v15 = vadd.s32 32, %v348_v14  ;;  %v361_v16 = vadd.s32 16, %v348_v14  ;;  %v379_v32 = vadd.s32 40, %v348_v14  ;;  %v367_v33 = vadd.s32 24, %v348_v14  ;;  %v341_v43 = vld [vmem:[%s680_s21 + $0x58] sm:$0xff] }
  0x11   : > { %274 = vmatpush.msra.mxu0 %v257_v2  ;;  %306 = vmatpush.msra.mxu1 %v286_v9  ;;  %v355_v34 = vadd.s32 8, %v348_v14  ;;  %v391_v35 = vadd.s32 56, %v348_v14  ;;  %v385_v36 = vadd.s32 48, %v348_v14  ;;  %v338_v37 = vld [vmem:[%s680_s21 + $0x40] sm:$0xff]  ;;  %v335_v48 = vld [vmem:[%s680_s21 + $0x28] sm:$0xff]  ;;  %v344_v57 = vld [vmem:[%s680_s21 + $0x70] sm:$0xff] }
  0x12   : > { %567 = vset.pattern.permute.xlu2 %v373_v15  ;;  %565 = vset.pattern.permute.xlu1 %v361_v16  ;;  %v334_v47 = vld [vmem:[%s680_s21 + $0x20] sm:$0xff]  ;;  %v331_v50 = vld [vmem:[%s680_s21 + $0x8] sm:$0xff]  ;;  %v345_v58 = vld [vmem:[%s680_s21 + $0x78] sm:$0xff] }
  0x13   : > { %275 = vmatpush.msra.mxu0 %v256_v3  ;;  %v330_v49 = vld [vmem:[%s680_s21] sm:$0xff]  ;;  %v336_v62 = vld [vmem:[%s680_s21 + $0x30] sm:$0xff]  ;;  %v337_v63 = vld [vmem:[%s680_s21 + $0x38] sm:$0xff] }
  0x14   : > { %v332_v0 = vld [vmem:[%s680_s21 + $0x10] sm:$0xff]  ;;  %v333_v1 = vld [vmem:[%s680_s21 + $0x18] sm:$0xff]  ;;  %v343_v9 = vld [vmem:[%s680_s21 + $0x68] sm:$0xff] }
  0x15   : > { %276 = vmatpush.msra.mxu0 %v255_v4 }
  0x17   : > { %277 = vmatpush.msra.mxu0 %v254_v5 }
  0x19   : > { %278 = vmatpush.msra.mxu0 %v253_v6 }
  0x1b   : > { %279 = vmatpush.msra.mxu0 %v252_v7 }
  0x1c   : > { %532 = vmatmul.msk.f32.vlgmr.msra.gmra.mxu0 %vm260_vm0, %v251_v8  ;;  %v342_v8 = vld [vmem:[%s680_s21 + $0x60] sm:$0xff] }
  0x99   : > { %v281_v10 = vpop.f32.mrf.mxu0 }
  0x9a   : > { %v284_v11 = vmul.f32 0.1, %v281_v10 }
  0x9c   : > { %v285_v12 = vmax.f32 %v281_v10, %v284_v11 }
  0x9e   : > { %533 = vmatmul.msk.f32.vlgmr.msra.gmra.mxu1 %vm287_vm1, %v285_v12 }
 0x11b   : > { %v308_v17 = vpop.f32.mrf.mxu1 }
 0x11c   : > { %v534_v18 = vmul.f32 -1.442695, %v308_v17 }
 0x11e   : > { %572 = vpow2.f32 %v534_v18 }
 0x124   : > { %v573_v19 = vpop.eup %572 }
 0x125   : > { %v314_v20 = vadd.f32 1.0, %v573_v19 }
 0x127   : > { %574 = vrcp.f32 %v314_v20  ;;  %v326_v24 = vand.u32 2147483648, %v314_v20  ;;  %v324_v26 = vand.u32 2147483647, %v314_v20  ;;  %vm320_vm3 = vweird.f32 %v314_v20 }
 0x129   : > { %v327_v28 = vor.u32 1.1754944e-38, %v326_v24  ;;  %vm325_vm5 = vcmp.eq.f32.partialorder %v324_v26, 8.507059e+37 }
 0x12d   : > { %v575_v21 = vpop.eup %574 }
 0x12e   : > { %v316_v22 = vmul.f32 %v575_v21, %v314_v20  ;;  %vm321_vm2 = vweird.f32 %v575_v21 }
 0x12f   : > { %vm322_vm4 = vmor %vm320_vm3, %vm321_vm2 }
 0x130   : > { %v317_v23 = vsub.f32 1.0, %v316_v22 }
 0x132   : > { %v318_v25 = vmul.f32 %v575_v21, %v317_v23 }
 0x134   : > { %v319_v27 = vadd.f32 %v575_v21, %v318_v25 }
 0x136   : > { %v323_v29 = vsel %vm322_vm4, %v575_v21, %v319_v27 }
 0x137   : > { %v328_v30 = vsel %vm325_vm5, %v327_v28, %v323_v29 }
 0x138   : > { %v346_v31 = vperm.slane %v328_v30, 0 }
 0x13a   : > { %375 = vperm.xlu2 %567, %v346_v31   ;;  %363 = vperm.xlu1 %565, %v346_v31  }
 0x13b   : > { %351 = vperm.xlu0 %563, %v346_v31  }
 0x142   : > { %568 = vset.pattern.permute.xlu2 %v379_v32  ;;  %566 = vset.pattern.permute.xlu1 %v367_v33 }
 0x143   : > { %564 = vset.pattern.permute.xlu0 %v355_v34 }
 0x14a   : > { %381 = vperm.xlu2 %568, %v346_v31   ;;  %369 = vperm.xlu1 %566, %v346_v31  }
 0x14b   : > { %357 = vperm.xlu0 %564, %v346_v31  }
 0x152   : > { %570 = vset.pattern.permute.xlu2 %v391_v35  ;;  %569 = vset.pattern.permute.xlu1 %v385_v36 }
 0x153   : > { %571 = vset.pattern.permute.xlu0 %v391_v35 }
 0x15a   : > { %393 = vperm.xlu2 %570, %v346_v31   ;;  %387 = vperm.xlu1 %569, %v346_v31  }
 0x194   : > { %v376_v39 = vpop.permute.xlu2 %375 }
 0x195   : > { %v403_v40 = vmul.f32 %v376_v39, %v338_v37  ;;  %v404_v41 = vmul.f32 %v376_v39, %v339_v38 }
 0x197   : > { %419 = vst [vmem:[%s687_s24 + $0x40] sm:$0xff] %v403_v40 }
 0x198   : > { %420 = vst [vmem:[%s687_s24 + $0x48] sm:$0xff] %v404_v41 }
 0x1a4   : > { %v382_v44 = vpop.permute.xlu2 %381 }
 0x1a5   : > { %v405_v45 = vmul.f32 %v382_v44, %v340_v42  ;;  %v406_v46 = vmul.f32 %v382_v44, %v341_v43 }
 0x1a7   : > { %421 = vst [vmem:[%s687_s24 + $0x50] sm:$0xff] %v405_v45 }
 0x1a8   : > { %422 = vst [vmem:[%s687_s24 + $0x58] sm:$0xff] %v406_v46 }
 0x1ac   : > { %v364_v51 = vpop.permute.xlu1 %363 }
 0x1ad   : > { %v399_v52 = vmul.f32 %v364_v51, %v334_v47  ;;  %v400_v53 = vmul.f32 %v364_v51, %v335_v48  ;;  %v352_v54 = vpop.permute.xlu0 %351 }
 0x1ae   : > { %v395_v55 = vmul.f32 %v352_v54, %v330_v49  ;;  %v396_v56 = vmul.f32 %v352_v54, %v331_v50 }
 0x1af   : > { %415 = vst [vmem:[%s687_s24 + $0x20] sm:$0xff] %v399_v52 }
 0x1b0   : > { %416 = vst [vmem:[%s687_s24 + $0x28] sm:$0xff] %v400_v53 }
 0x1b1   : > { %411 = vst [vmem:[%s687_s24] sm:$0xff] %v395_v55 }
 0x1b2   : > { %412 = vst [vmem:[%s687_s24 + $0x8] sm:$0xff] %v396_v56 }
 0x1b4   : > { %v394_v59 = vpop.permute.xlu2 %393 }
 0x1b5   : > { %v409_v60 = vmul.f32 %v394_v59, %v344_v57  ;;  %v410_v61 = vmul.f32 %v394_v59, %v345_v58 }
 0x1b7   : > { %425 = vst [vmem:[%s687_s24 + $0x70] sm:$0xff] %v409_v60 }
 0x1b8   : > { %426 = vst [vmem:[%s687_s24 + $0x78] sm:$0xff] %v410_v61 }
 0x1bc   : > { %v370_v2 = vpop.permute.xlu1 %369 }
 0x1bd   : > { %v401_v3 = vmul.f32 %v370_v2, %v336_v62  ;;  %v402_v4 = vmul.f32 %v370_v2, %v337_v63  ;;  %v358_v5 = vpop.permute.xlu0 %357 }
 0x1be   : > { %v397_v6 = vmul.f32 %v358_v5, %v332_v0  ;;  %v398_v7 = vmul.f32 %v358_v5, %v333_v1 }
 0x1bf   : > { %417 = vst [vmem:[%s687_s24 + $0x30] sm:$0xff] %v401_v3 }
 0x1c0   : > { %418 = vst [vmem:[%s687_s24 + $0x38] sm:$0xff] %v402_v4 }
 0x1c1   : > { %413 = vst [vmem:[%s687_s24 + $0x10] sm:$0xff] %v397_v6 }
 0x1c2   : > { %414 = vst [vmem:[%s687_s24 + $0x18] sm:$0xff] %v398_v7 }
 0x1cc   : > { %v388_v10 = vpop.permute.xlu1 %387 }
 0x1cd   : > { %v407_v11 = vmul.f32 %v388_v10, %v342_v8  ;;  %v408_v12 = vmul.f32 %v388_v10, %v343_v9 }
 0x1cf   : > { %423 = vst [vmem:[%s687_s24 + $0x60] sm:$0xff] %v407_v11 }
 0x1d0   : > { %424 = vst [vmem:[%s687_s24 + $0x68] sm:$0xff] %v408_v12 }
 0x1d1 PF: > { %s14_s17 = sadd.s32 1, %s598_s17   ;;  %s733_s15 = smov %s594_s16 }
 0x1d2   : > { %p11_p5 = scmp.ge.s32.totalorder %s14_s17, 4   ;;  %s734_s16 = smov %s736_s18 }
 0x1d4   :  { %13 = sbr.rel (!%p11_p5) target bundleno = 2 (0x2), region = 69 }

</bundles_post_ra>
